<compile_context>
chip_gen: v6e
topology: v6e:2x2x1
jax: 0.10.0
libtpu: 0.0.40
codegen_flags: <defaults>
</compile_context>

<pallas_src>
import functools

import jax
import jax.numpy as jnp
from jax import lax
from jax.experimental import pallas as pl
from jax.experimental.pallas import tpu as pltpu

LANE = 128
SUBLANE = 8


def _round_up(x, m):
    return ((x + m - 1) // m) * m


def prepare_params(weight, bias, *, use_bf16_matmul=False):
    """One-time parameter prep: pad (n_class, in_dim) -> (ncp, kp) lane-dense
    layout (multiples of 128) and optionally cast the weight to bf16.

    Do this once at setup time so the per-call forward pays no pad/cast pass.
    """
    n_class, in_dim = weight.shape
    ncp = _round_up(n_class, LANE)
    kp = _round_up(in_dim, LANE)
    w = weight
    if (ncp, kp) != (n_class, in_dim):
        w = jnp.pad(w, ((0, ncp - n_class), (0, kp - in_dim)))
    b = bias
    if ncp != n_class:
        b = jnp.pad(b, (0, ncp - n_class))
    b = b.reshape(1, ncp)
    if use_bf16_matmul:
        w = w.astype(jnp.bfloat16)
    return w, b


def _linear_kernel_resident(x_ref, w_ref, b_ref, o_ref, *, cast_bf16, apply_sigmoid):
    # x_ref: (TM, KP)  w_ref: (NCP, KP)  b_ref: (1, NCP)  o_ref: (TM, NCP)
    x = x_ref[...]
    w = w_ref[...]
    if cast_bf16:
        x = x.astype(jnp.bfloat16)
    # (TM, KP) contracted with (NCP, KP) on dim 1 -> (TM, NCP); no W.T anywhere.
    out = lax.dot_general(
        x, w,
        dimension_numbers=(((1,), (1,)), ((), ())),
        preferred_element_type=jnp.float32)
    out = out + b_ref[...]
    if apply_sigmoid:
        out = jax.nn.sigmoid(out)
    o_ref[...] = out.astype(o_ref.dtype)


def _linear_kernel_ktiled(x_ref, w_ref, b_ref, o_ref, acc_ref, *, cast_bf16, apply_sigmoid):
    # Fallback path for very large in_dim (weight does not fit VMEM budget).
    k = pl.program_id(1)

    @pl.when(k == 0)
    def _():
        acc_ref[...] = jnp.zeros_like(acc_ref)

    x = x_ref[...]
    w = w_ref[...]
    if cast_bf16:
        x = x.astype(jnp.bfloat16)
    acc_ref[...] += lax.dot_general(
        x, w,
        dimension_numbers=(((1,), (1,)), ((), ())),
        preferred_element_type=jnp.float32)

    @pl.when(k == pl.num_programs(1) - 1)
    def _():
        out = acc_ref[...] + b_ref[...]
        if apply_sigmoid:
            out = jax.nn.sigmoid(out)
        o_ref[...] = out.astype(o_ref.dtype)


def logistic_regression_forward(x, weight_p, bias_p, n_class, *,
                                apply_sigmoid=False,
                                tm=512,
                                tk_max=1024,
                                weight_resident_budget=20 * 1024 * 1024,
                                out_dtype=None):
    """out = x @ weight.T + bias (torch.nn.Linear semantics).

    x: (B, in_dim). weight_p/bias_p come from prepare_params() (padded layout).
    """
    B, in_dim = x.shape
    ncp, kp = weight_p.shape
    assert bias_p.shape == (1, ncp)
    assert n_class <= ncp

    # Rare path: pad x's K dim with zeros to match the padded weight K.
    if in_dim != kp:
        assert in_dim < kp
        x = jnp.pad(x, ((0, 0), (0, kp - in_dim)))

    if out_dtype is None:
        out_dtype = x.dtype
    out_itemsize = jnp.dtype(out_dtype).itemsize
    cast_bf16 = (weight_p.dtype == jnp.bfloat16) and (x.dtype != jnp.bfloat16)

    # ---- K tiling: keep the whole weight VMEM-resident whenever it fits. ----
    w_bytes = ncp * kp * weight_p.dtype.itemsize
    if w_bytes <= weight_resident_budget:
        TK = kp
        grid_k = 1
    else:
        # Largest multiple-of-128 divisor of kp that is <= tk_max (kp is
        # always a multiple of 128, so TK=128 is the worst case -> no ragged K).
        TK = LANE
        for cand in range(tk_max - tk_max % LANE, LANE - 1, -LANE):
            if kp % cand == 0:
                TK = cand
                break
        grid_k = kp // TK

    # ---- M tiling: big tiles, but ensure grid_m >= 2 when the batch allows
    #      (v7x megacore) and bound the x tile so double-buffering fits VMEM. ----
    if B <= 2 * SUBLANE:
        TM = B
    else:
        TM = min(tm, _round_up(pl.cdiv(B, 2), SUBLANE), _round_up(B, SUBLANE))
    X_TILE_BUDGET = 8 * 1024 * 1024  # bytes per pipeline buffer of x
    max_tm = max(SUBLANE,
                 (X_TILE_BUDGET // (TK * x.dtype.itemsize)) // SUBLANE * SUBLANE)
    TM = min(TM, max_tm)
    grid_m = pl.cdiv(B, TM)

    # ---- VMEM budget hint for the compiler (stay under v7x's 64 MiB/TC). ----
    est = (2 * TM * TK * x.dtype.itemsize            # x (double-buffered)
           + 2 * ncp * TK * weight_p.dtype.itemsize  # weight
           + 2 * TM * ncp * out_itemsize             # output tile
           + (TM * ncp * 4 if grid_k > 1 else 0)     # accumulator scratch
           + 2 * ncp * 4)                            # bias
    vmem_limit = int(min(56 * 1024 * 1024, max(32 * 1024 * 1024, est * 1.5)))

    cost = pl.CostEstimate(
        flops=2 * B * kp * ncp,
        transcendentals=(B * ncp) if apply_sigmoid else 0,
        bytes_accessed=(B * kp * x.dtype.itemsize
                        + w_bytes
                        + ncp * 4
                        + B * ncp * out_itemsize))

    if grid_k == 1:
        kernel = functools.partial(_linear_kernel_resident,
                                   cast_bf16=cast_bf16,
                                   apply_sigmoid=apply_sigmoid)
        grid_spec = pltpu.PrefetchScalarGridSpec(
            num_scalar_prefetch=0,
            grid=(grid_m,),
            in_specs=[
                pl.BlockSpec((TM, TK), lambda i: (i, 0)),   # x tile
                pl.BlockSpec((ncp, TK), lambda i: (0, 0)),  # whole weight, fetched once
                pl.BlockSpec((1, ncp), lambda i: (0, 0)),   # bias (grid-invariant)
            ],
            out_specs=pl.BlockSpec((TM, ncp), lambda i: (i, 0)),
            scratch_shapes=[],
        )
        dim_sem = ("parallel",)
    else:
        kernel = functools.partial(_linear_kernel_ktiled,
                                   cast_bf16=cast_bf16,
                                   apply_sigmoid=apply_sigmoid)
        grid_spec = pltpu.PrefetchScalarGridSpec(
            num_scalar_prefetch=0,
            grid=(grid_m, grid_k),
            in_specs=[
                pl.BlockSpec((TM, TK), lambda i, k: (i, k)),
                pl.BlockSpec((ncp, TK), lambda i, k: (0, k)),
                pl.BlockSpec((1, ncp), lambda i, k: (0, 0)),
            ],
            out_specs=pl.BlockSpec((TM, ncp), lambda i, k: (i, 0)),
            scratch_shapes=[pltpu.VMEM((TM, ncp), jnp.float32)],
        )
        dim_sem = ("parallel", "arbitrary")

    out_padded = pl.pallas_call(
        kernel,
        out_shape=jax.ShapeDtypeStruct((B, ncp), out_dtype),
        grid_spec=grid_spec,
        compiler_params=pltpu.CompilerParams(
            dimension_semantics=dim_sem,
            vmem_limit_bytes=vmem_limit),
        cost_estimate=cost,
    )(x, weight_p, bias_p)

    if ncp == n_class:
        return out_padded
    # TODO(synk): a downstream consumer could read the padded (B, ncp) buffer
    # directly / fuse this slice; kept here for drop-in nn.Linear semantics.
    return out_padded[:, :n_class]


if __name__ == "__main__":
    key = jax.random.PRNGKey(0)
    kx, kw, kb = jax.random.split(key, 3)

    # --- Small shapes consistent with the module: in_dim -> n_class logits. ---
    batch, in_dim, n_class = 8, 32, 16
    x = jax.random.normal(kx, (batch, in_dim), dtype=jnp.float32)
    bound = 1.0 / jnp.sqrt(in_dim)
    weight = jax.random.uniform(kw, (n_class, in_dim), jnp.float32, -bound, bound)
    bias = jax.random.uniform(kb, (n_class,), jnp.float32, -bound, bound)

    w_p, b_p = prepare_params(weight, bias)
    out = jax.block_until_ready(
        logistic_regression_forward(x, w_p, b_p, n_class))
    ref = x @ weight.T + bias
    assert out.shape == (batch, n_class)
    assert jnp.allclose(out, ref, atol=1e-4, rtol=1e-4)

    # --- Weight-resident path with multiple M tiles (grid_m >= 2). ---
    B2, D2, C2 = 512, 1024, 16
    k2x, k2w, k2b = jax.random.split(jax.random.PRNGKey(1), 3)
    x2 = jax.random.normal(k2x, (B2, D2), dtype=jnp.float32)
    w2 = jax.random.normal(k2w, (C2, D2), dtype=jnp.float32) * (1.0 / jnp.sqrt(D2))
    b2 = jax.random.normal(k2b, (C2,), dtype=jnp.float32)
    ref2 = jnp.dot(x2, w2.T, precision=jax.lax.Precision.HIGHEST) + b2

    w2_p, b2_p = prepare_params(w2, b2)
    out2 = jax.block_until_ready(
        logistic_regression_forward(x2, w2_p, b2_p, C2))
    assert out2.shape == (B2, C2)
    assert jnp.allclose(out2, ref2, atol=1e-2, rtol=1e-2)

    # --- Force the K-tiled accumulator fallback path (tiny residency budget). ---
    out3 = jax.block_until_ready(
        logistic_regression_forward(x2, w2_p, b2_p, C2,
                                    weight_resident_budget=1, tk_max=256))
    assert jnp.allclose(out3, ref2, atol=1e-2, rtol=1e-2)

    # --- bf16 MXU operands (weight pre-cast once), relaxed tolerance. ---
    w2_bf, b2_bf = prepare_params(w2, b2, use_bf16_matmul=True)
    out4 = jax.block_until_ready(
        logistic_regression_forward(x2, w2_bf, b2_bf, C2))
    assert jnp.allclose(out4, ref2, atol=5e-2, rtol=5e-2)

    print("KERNEL_OK")
</pallas_src>

<mosaic_0001>
module attributes {stable_mosaic.version = 11 : i64} {
  func.func @_linear_kernel_resident(%arg0: i32, %arg1: memref<8x128xf32, #tpu.memory_space<vmem>>, %arg2: memref<128x128xf32, #tpu.memory_space<vmem>>, %arg3: memref<1x128xf32, #tpu.memory_space<vmem>>, %arg4: memref<8x128xf32, #tpu.memory_space<vmem>>) attributes {dimension_semantics = [#tpu.dimension_semantics<parallel>], iteration_bounds = array<i64: 1>, scalar_prefetch = 0 : i64, scratch_operands = 0 : i64, tpu.core_type = #tpu.core_type<tc>, window_params = [{transform_indices = @transform_0, window_bounds = array<i64: 8, 128>}, {pipeline_mode = #tpu.pipeline_mode<synchronous>, transform_indices = @transform_1, window_bounds = array<i64: 128, 128>}, {pipeline_mode = #tpu.pipeline_mode<synchronous>, transform_indices = @transform_2, window_bounds = array<i64: 1, 128>}, {transform_indices = @transform_3, window_bounds = array<i64: 8, 128>}]} {
    %c0 = arith.constant 0 : index
    %c0_0 = arith.constant 0 : index
    %0 = vector.load %arg1[%c0, %c0_0] : memref<8x128xf32, #tpu.memory_space<vmem>>, vector<8x128xf32>
    %c0_1 = arith.constant 0 : index
    %c0_2 = arith.constant 0 : index
    %1 = vector.load %arg2[%c0_1, %c0_2] : memref<128x128xf32, #tpu.memory_space<vmem>>, vector<128x128xf32>
    %cst = arith.constant dense<0.000000e+00> : vector<8x128xf32>
    %2 = tpu.matmul %0, %1, %cst {dimension_numbers = #tpu.dot_dimension_numbers<[1], [1], [0], [0], [0, 0, 1, 0], [], []>} : vector<8x128xf32>, vector<128x128xf32>, vector<8x128xf32> -> vector<8x128xf32>
    %c0_3 = arith.constant 0 : index
    %c0_4 = arith.constant 0 : index
    %3 = vector.load %arg3[%c0_3, %c0_4] : memref<1x128xf32, #tpu.memory_space<vmem>>, vector<1x128xf32>
    %4 = vector.broadcast %3 : vector<1x128xf32> to vector<8x128xf32>
    %5 = arith.addf %2, %4 : vector<8x128xf32>
    %c0_5 = arith.constant 0 : index
    %c0_6 = arith.constant 0 : index
    %6 = vector.load %arg4[%c0_5, %c0_6] : memref<8x128xf32, #tpu.memory_space<vmem>>, vector<8x128xf32>
    tpu.vector_store %arg4[%c0_5, %c0_6], %5 {strides = array<i32>} : memref<8x128xf32, #tpu.memory_space<vmem>>, vector<8x128xf32>,
    return
  }
  func.func @transform_0(%arg0: i32) -> (i32, i32) {
    %c0_i32 = arith.constant 0 : i32
    %c0_i32_0 = arith.constant 0 : i32
    return %arg0, %c0_i32 : i32, i32
  }
  func.func @transform_1(%arg0: i32) -> (i32, i32) {
    %c0_i32 = arith.constant 0 : i32
    %c0_i32_0 = arith.constant 0 : i32
    %c0_i32_1 = arith.constant 0 : i32
    return %c0_i32, %c0_i32_0 : i32, i32
  }
  func.func @transform_2(%arg0: i32) -> (i32, i32) {
    %c0_i32 = arith.constant 0 : i32
    %c0_i32_0 = arith.constant 0 : i32
    %c0_i32_1 = arith.constant 0 : i32
    return %c0_i32, %c0_i32_0 : i32, i32
  }
  func.func @transform_3(%arg0: i32) -> (i32, i32) {
    %c0_i32 = arith.constant 0 : i32
    %c0_i32_0 = arith.constant 0 : i32
    return %arg0, %c0_i32 : i32, i32
  }
}

</mosaic_0001>

<bundles_post_ra>
// kernel: tpu_custom_call.1
= control target key start
LH: loop header
LB: loop body
LE: loop exit
PB: predicated region body
PF: predicated region fallthrough
CT: control target
= control target key end

     0   :  { %8 = vsyncpa [#allocation3], 0  ;;  %s317_s0 = inlined_call_operand.hbm [shape: f32[8,128], index: 0, kind: input, shape index: {}]   ;;  %s318_s1 = inlined_call_operand.hbm [shape: f32[128,128], index: 1, kind: input, shape index: {}]   ;;  %s319_s2 = inlined_call_operand.vmem [shape: f32[1,128], index: 2, kind: input, shape index: {}]   ;;  %s320_s3 = inlined_call_operand.hbm [shape: f32[8,128], index: 3, kind: output, shape index: {}]  }
   0x1   :  { %9 = vsyncpa [#allocation6], 0 }
   0x2   :  { %10 = vsyncpa [#allocation4], 0  ;;  %s278_s12 = smov [#allocation2]   ;;  %s279_s14 = smov [#allocation5]  }
   0x3   :  { %s17_s13 = sshll.u32 %s278_s12, 4  ;;  %s26_s15 = sshll.u32 %s279_s14, 4  ;;  %s18_s13 = int_to_ptr.vmem [resolvable:$true] %s17_s13  ;;  %s27_s15 = int_to_ptr.vmem [resolvable:$true] %s26_s15 }
   0x4   :  { %s220_s16 = scalar_lea.vmem %s18_s13, 128  ;;  %p225_p1 = scmp.lt.s32.totalorder %s18_s13, %s18_s13 }
   0x5   :  { %p221_p0 = scmp.ne.s32.totalorder %s18_s13, %s220_s16  ;;  %p226_p2 = scmp.lt.s32.totalorder %s220_s16, %s220_s16 }
   0x7   :  { %p227_p3 = por %p226_p2, %p225_p1 }
   0x9   :  { %p228_p4 = pnand %p227_p3, %p221_p0 }
   0xb   :  { %231 = shalt.err (!%p228_p4)
}
   0xc   :  { %20 = dma.hbm_to_vmem [thread:$0]  %s317_s0, 128, %s18_s13, [#allocation3]  }
   0xd   :  { %s240_s19 = scalar_lea.vmem %s27_s15, 2048  ;;  %p245_p6 = scmp.lt.s32.totalorder %s27_s15, %s27_s15 }
   0xe   :  { %p241_p5 = scmp.ne.s32.totalorder %s27_s15, %s240_s19  ;;  %p246_p7 = scmp.lt.s32.totalorder %s240_s19, %s240_s19 }
  0x10   :  { %p247_p8 = por %p246_p7, %p245_p6 }
  0x12   :  { %p248_p9 = pnand %p247_p8, %p241_p5 }
  0x14   :  { %251 = shalt.err (!%p248_p9)
}
  0x15   :  { %s280_s20 = smov 128   ;;  %s281_s21 = smov 8  }
  0x16   :  { %32 = dma.hbm_to_vmem [thread:$0]  %s318_s1, 2048, %s27_s15, [#allocation6], %s280_s20, %s280_s20, %s281_s21  }
  0x17   :  { %272 = dma.done.wait [#allocation3], 128  }
  0x18   :  { %273 = vsyncadd [#allocation3], 4294967168 }
  0x19   :  { %274 = dma.done.wait [#allocation6], 2048  }
  0x1a   :  { %275 = vsyncadd [#allocation6], 4294965248  ;;  %v282_v0 = vmov 0.0   ;;  %vm283_vm0 = vmmov 0   ;;  %v57_v1 = vld [vmem:[#allocation5 + $0x78] sm:$0xff]  ;;  %v56_v2 = vld [vmem:[#allocation5 + $0x70] sm:$0xff] }
  0x1b   :  { %170 = vmatprep.subr.mxu0 %v282_v0  ;;  %202 = vmatprep.mubr.msk.f32.mxu0 %vm283_vm0, %v282_v0  ;;  %v55_v3 = vld [vmem:[#allocation5 + $0x68] sm:$0xff]  ;;  %v54_v4 = vld [vmem:[#allocation5 + $0x60] sm:$0xff]  ;;  %v53_v5 = vld [vmem:[#allocation5 + $0x58] sm:$0xff]  ;;  %s284_s24 = smov [#allocation7]  }
  0x1c   :  { %171 = vmatpush3.xpose.msra.mxu0 %v57_v1  ;;  %v52_v6 = vld [vmem:[#allocation5 + $0x50] sm:$0xff]  ;;  %v51_v7 = vld [vmem:[#allocation5 + $0x48] sm:$0xff]  ;;  %v50_v8 = vld [vmem:[#allocation5 + $0x40] sm:$0xff]  ;;  %s142_s25 = sshll.u32 %s284_s24, 4  ;;  %s143_s25 = int_to_ptr.vmem [resolvable:$true] %s142_s25 }
  0x1d   :  { %172 = vmatprep.subr.mxu0 %v282_v0  ;;  %v49_v9 = vld [vmem:[#allocation5 + $0x38] sm:$0xff]  ;;  %v48_v10 = vld [vmem:[#allocation5 + $0x30] sm:$0xff]  ;;  %v47_v11 = vld [vmem:[#allocation5 + $0x28] sm:$0xff]  ;;  %s252_s26 = scalar_lea.vmem %s143_s25, 128  ;;  %p257_p11 = scmp.lt.s32.totalorder %s143_s25, %s143_s25 }
  0x1e   :  { %v46_v12 = vld [vmem:[#allocation5 + $0x20] sm:$0xff]  ;;  %v45_v13 = vld [vmem:[#allocation5 + $0x18] sm:$0xff]  ;;  %v44_v14 = vld [vmem:[#allocation5 + $0x10] sm:$0xff]  ;;  %p253_p10 = scmp.ne.s32.totalorder %s143_s25, %s252_s26  ;;  %p258_p12 = scmp.lt.s32.totalorder %s252_s26, %s252_s26 }
  0x1f   :  { %v43_v15 = vld [vmem:[#allocation5 + $0x8] sm:$0xff]  ;;  %v42_v16 = vld [vmem:[#allocation5] sm:$0xff]  ;;  %v41_v17 = vld [vmem:[#allocation2] sm:$0xff] }
  0x20   :  { %173 = vmatpush3.xpose.msra.mxu0 %v56_v2  ;;  %v152_v18 = vld [vmem:[%s319_s2] ss:$0 sm:$0xff]  ;;  %p259_p13 = por %p258_p12, %p257_p11 }
  0x21   :  { %174 = vmatprep.subr.mxu0 %v282_v0 }
  0x22   :  { %p260_p0 = pnand %p259_p13, %p253_p10 }
  0x24   :  { %175 = vmatpush3.xpose.msra.mxu0 %v55_v3 }
  0x25   :  { %176 = vmatprep.subr.mxu0 %v282_v0 }
  0x28   :  { %177 = vmatpush3.xpose.msra.mxu0 %v54_v4 }
  0x29   :  { %178 = vmatprep.subr.mxu0 %v282_v0 }
  0x2c   :  { %179 = vmatpush3.xpose.msra.mxu0 %v53_v5 }
  0x2d   :  { %180 = vmatprep.subr.mxu0 %v282_v0 }
  0x30   :  { %181 = vmatpush3.xpose.msra.mxu0 %v52_v6 }
  0x31   :  { %182 = vmatprep.subr.mxu0 %v282_v0 }
  0x34   :  { %183 = vmatpush3.xpose.msra.mxu0 %v51_v7 }
  0x35   :  { %184 = vmatprep.subr.mxu0 %v282_v0 }
  0x38   :  { %185 = vmatpush3.xpose.msra.mxu0 %v50_v8 }
  0x39   :  { %186 = vmatprep.subr.mxu0 %v282_v0 }
  0x3c   :  { %187 = vmatpush3.xpose.msra.mxu0 %v49_v9 }
  0x3d   :  { %188 = vmatprep.subr.mxu0 %v282_v0 }
  0x40   :  { %189 = vmatpush3.xpose.msra.mxu0 %v48_v10 }
  0x41   :  { %190 = vmatprep.subr.mxu0 %v282_v0 }
  0x44   :  { %191 = vmatpush3.xpose.msra.mxu0 %v47_v11 }
  0x45   :  { %192 = vmatprep.subr.mxu0 %v282_v0 }
  0x48   :  { %193 = vmatpush3.xpose.msra.mxu0 %v46_v12 }
  0x49   :  { %194 = vmatprep.subr.mxu0 %v282_v0 }
  0x4c   :  { %195 = vmatpush3.xpose.msra.mxu0 %v45_v13 }
  0x4d   :  { %196 = vmatprep.subr.mxu0 %v282_v0 }
  0x50   :  { %197 = vmatpush3.xpose.msra.mxu0 %v44_v14 }
  0x51   :  { %198 = vmatprep.subr.mxu0 %v282_v0 }
  0x54   :  { %199 = vmatpush3.xpose.msra.mxu0 %v43_v15 }
  0x55   :  { %200 = vmatprep.subr.mxu0 %v282_v0 }
  0x58   :  { %201 = vmatpush3.xpose.msra.mxu0 %v42_v16 }
  0x5b   :  { %203 = vmatmul.mubr.f32.vlgmr.msra.gmra.mxu0 %v41_v17 }
 0x11b   :  { %v131_v19 = vpop.f32.mrf.mxu0 }
 0x11c   :  { %v132_v20 = vadd.f32 %v152_v18, %v131_v19 }
 0x11d   :  { %v204_v21 = vpop.f32.mrf.mxu0 }
 0x11e   :  { %135 = vst [vmem:[#allocation7] sm:$0xff] %v132_v20 }
 0x11f   :  { %263 = shalt.err (!%p260_p0)
}
 0x120   :  { %145 = dma.vmem_to_hbm [thread:$0]  %s143_s25, 128, %s320_s3, [#allocation4]  }
 0x121   :  { %276 = dma.done.wait [#allocation4], 128  }
 0x122   :  { %277 = vsyncadd [#allocation4], 4294967168 }
 0x123   :  { %149 = vsyncpa [#allocation3], 1 }
 0x124   :  { %150 = vsyncpa [#allocation6], 1 }
 0x125   :  { %151 = vsyncpa [#allocation4], 1 }

</bundles_post_ra>
